<compile_context>
chip_gen: v7x
topology: tpu7x:2x2x1
jax: 0.10.0
libtpu: 0.0.40
codegen_flags: <defaults>
</compile_context>

<pallas_src>
import functools
import math

import jax
import jax.numpy as jnp
from jax import lax
from jax.experimental import pallas as pl
from jax.experimental.pallas import tpu as pltpu


def mhsa_kernel(x_ref, wq_ref, wk_ref, wv_ref, o_ref, *, num_heads, scale):
    # x_ref:  (1, n, dim_in)     -- one batch element
    # wq_ref: (dim_in, dim_k)    -- full Q projection (pre-transposed), VMEM-resident
    # wk_ref: (dim_in, dim_k)
    # wv_ref: (dim_in, dim_v)
    # o_ref:  (1, n, dim_v)      -- final output layout, written directly
    x = x_ref[0]                 # (n, dim_in)
    dt = x.dtype                 # MXU input dtype (bf16 if inputs are bf16)

    # One wide projection per batch element for ALL heads at once (f32 accumulate).
    q = jnp.dot(x, wq_ref[...], preferred_element_type=jnp.float32)   # (n, dim_k)
    k = jnp.dot(x, wk_ref[...], preferred_element_type=jnp.float32)   # (n, dim_k)
    v = jnp.dot(x, wv_ref[...], preferred_element_type=jnp.float32)   # (n, dim_v)

    # Fold 1/sqrt(dk) into q: n*dim_k VPU ops instead of n*n on the score matrix.
    q = q * jnp.float32(scale)

    dim_k = q.shape[-1]
    dim_v = v.shape[-1]
    dk = dim_k // num_heads
    dv = dim_v // num_heads

    # Static (unrolled) loop over heads; all slices are static column ranges.
    for h in range(num_heads):
        qh = q[:, h * dk:(h + 1) * dk].astype(dt)    # (n, dk)
        kh = k[:, h * dk:(h + 1) * dk].astype(dt)    # (n, dk)
        vh = v[:, h * dv:(h + 1) * dv].astype(dt)    # (n, dv)

        # Scores: contract on the shared last axis -- no in-kernel transpose.
        s = lax.dot_general(qh, kh, (((1,), (1,)), ((), ())),
                            preferred_element_type=jnp.float32)       # (n, n)

        # Numerically-stable softmax over keys, kept in f32 on the VPU/EUP.
        m = jnp.max(s, axis=-1, keepdims=True)
        p = jnp.exp(s - m)
        l = jnp.sum(p, axis=-1, keepdims=True)                        # (n, 1)

        att = jnp.dot(p.astype(dt), vh,
                      preferred_element_type=jnp.float32)             # (n, dv)
        # Normalize after the PV matmul (n*dv elements) with the EUP reciprocal.
        att = att * pl.reciprocal(l, approx=True)

        # Head h owns columns [h*dv, (h+1)*dv) of the final [n, dim_v] output.
        o_ref[0, :, h * dv:(h + 1) * dv] = att.astype(o_ref.dtype)


def multi_head_self_attention(x, wq, wk, wv, num_heads):
    """x: (batch, n, dim_in); wq/wk: (dim_k, dim_in); wv: (dim_v, dim_in)."""
    batch, n, dim_in = x.shape
    dim_k = wq.shape[0]
    dim_v = wv.shape[0]
    assert dim_k % num_heads == 0 and dim_v % num_heads == 0
    dk = dim_k // num_heads
    scale = 1.0 / math.sqrt(dk)   # norm_fact = 1/sqrt(dim_k // nh)

    # nn.Linear stores W as (out, in); transpose once in the wrapper (free
    # layout plumbing) so the kernel contracts x's last axis directly.
    wq_t = wq.T   # (dim_in, dim_k)
    wk_t = wk.T   # (dim_in, dim_k)
    wv_t = wv.T   # (dim_in, dim_v)

    kernel = functools.partial(mhsa_kernel, num_heads=num_heads, scale=scale)

    out = pl.pallas_call(
        kernel,
        out_shape=jax.ShapeDtypeStruct((batch, n, dim_v), x.dtype),
        grid=(batch,),
        in_specs=[
            pl.BlockSpec((1, n, dim_in), lambda b: (b, 0, 0)),
            # Constant index_map -> weights stay resident in VMEM across the grid.
            pl.BlockSpec((dim_in, dim_k), lambda b: (0, 0)),
            pl.BlockSpec((dim_in, dim_k), lambda b: (0, 0)),
            pl.BlockSpec((dim_in, dim_v), lambda b: (0, 0)),
        ],
        # Final [batch, n, dim_v] layout written directly -- no post transpose.
        out_specs=pl.BlockSpec((1, n, dim_v), lambda b: (b, 0, 0)),
        compiler_params=pltpu.CompilerParams(
            dimension_semantics=("parallel",),
            vmem_limit_bytes=64 * 1024 * 1024,
        ),
    )(x, wq_t, wk_t, wv_t)
    return out


def mhsa_reference(x, wq, wk, wv, num_heads):
    """Pure-JAX reference mirroring the PyTorch forward."""
    batch, n, dim_in = x.shape
    dim_k, dim_v = wq.shape[0], wv.shape[0]
    nh = num_heads
    dk, dv = dim_k // nh, dim_v // nh
    q = (x @ wq.T).reshape(batch, n, nh, dk).transpose(0, 2, 1, 3)
    k = (x @ wk.T).reshape(batch, n, nh, dk).transpose(0, 2, 1, 3)
    v = (x @ wv.T).reshape(batch, n, nh, dv).transpose(0, 2, 1, 3)
    dist = jnp.einsum("bhqd,bhkd->bhqk", q, k) * (1.0 / math.sqrt(dk))
    dist = jax.nn.softmax(dist, axis=3)
    att = jnp.einsum("bhqk,bhkd->bhqd", dist, v)
    return att.transpose(0, 2, 1, 3).reshape(batch, n, dim_v)


if __name__ == "__main__":
    batch, n, dim_in = 2, 8, 32
    dim_k, dim_v, num_heads = 32, 32, 4

    key = jax.random.PRNGKey(0)
    kx, kq, kk, kv = jax.random.split(key, 4)
    x = jax.random.normal(kx, (batch, n, dim_in), dtype=jnp.float32)
    # deterministic "kaiming-uniform-ish" init for the three bias-free Linear layers
    bound = 1.0 / math.sqrt(dim_in)
    wq = jax.random.uniform(kq, (dim_k, dim_in), jnp.float32, -bound, bound)
    wk = jax.random.uniform(kk, (dim_k, dim_in), jnp.float32, -bound, bound)
    wv = jax.random.uniform(kv, (dim_v, dim_in), jnp.float32, -bound, bound)

    out = multi_head_self_attention(x, wq, wk, wv, num_heads)
    out = jax.block_until_ready(out)

    ref = mhsa_reference(x, wq, wk, wv, num_heads)
    assert out.shape == (batch, n, dim_v)
    # Tolerance accounts for the EUP approximate reciprocal in the softmax
    # normalization (relative error ~1e-4); any structural bug would be >> this.
    assert jnp.allclose(out, ref, atol=1e-2, rtol=1e-2), "mismatch vs reference"
    print("KERNEL_OK")
</pallas_src>

<mosaic_0001>
module attributes {stable_mosaic.version = 11 : i64} {
  func.func @mhsa_kernel(%arg0: i32, %arg1: memref<1x8x32xf32, #tpu.memory_space<vmem>>, %arg2: memref<32x32xf32, #tpu.memory_space<vmem>>, %arg3: memref<32x32xf32, #tpu.memory_space<vmem>>, %arg4: memref<32x32xf32, #tpu.memory_space<vmem>>, %arg5: memref<1x8x32xf32, #tpu.memory_space<vmem>>) attributes {dimension_semantics = [#tpu.dimension_semantics<parallel>], iteration_bounds = array<i64: 2>, scalar_prefetch = 0 : i64, scratch_operands = 0 : i64, tpu.core_type = #tpu.core_type<tc>, window_params = [{transform_indices = @transform_0, window_bounds = array<i64: 1, 8, 32>}, {pipeline_mode = #tpu.pipeline_mode<synchronous>, transform_indices = @transform_1, window_bounds = array<i64: 32, 32>}, {pipeline_mode = #tpu.pipeline_mode<synchronous>, transform_indices = @transform_2, window_bounds = array<i64: 32, 32>}, {pipeline_mode = #tpu.pipeline_mode<synchronous>, transform_indices = @transform_3, window_bounds = array<i64: 32, 32>}, {transform_indices = @transform_4, window_bounds = array<i64: 1, 8, 32>}]} {
    %c0 = arith.constant 0 : index
    %c0_0 = arith.constant 0 : index
    %c0_1 = arith.constant 0 : index
    %0 = vector.load %arg1[%c0, %c0_0, %c0_1] : memref<1x8x32xf32, #tpu.memory_space<vmem>>, vector<1x8x32xf32>
    %1 = vector.shape_cast %0 : vector<1x8x32xf32> to vector<8x32xf32>
    %c0_2 = arith.constant 0 : index
    %c0_3 = arith.constant 0 : index
    %2 = vector.load %arg2[%c0_2, %c0_3] : memref<32x32xf32, #tpu.memory_space<vmem>>, vector<32x32xf32>
    %cst = arith.constant dense<0.000000e+00> : vector<8x32xf32>
    %3 = tpu.matmul %1, %2, %cst {dimension_numbers = #tpu.dot_dimension_numbers<[1], [0], [0], [1], [0, 0, 1, 1], [], []>} : vector<8x32xf32>, vector<32x32xf32>, vector<8x32xf32> -> vector<8x32xf32>
    %c0_4 = arith.constant 0 : index
    %c0_5 = arith.constant 0 : index
    %4 = vector.load %arg3[%c0_4, %c0_5] : memref<32x32xf32, #tpu.memory_space<vmem>>, vector<32x32xf32>
    %cst_6 = arith.constant dense<0.000000e+00> : vector<8x32xf32>
    %5 = tpu.matmul %1, %4, %cst_6 {dimension_numbers = #tpu.dot_dimension_numbers<[1], [0], [0], [1], [0, 0, 1, 1], [], []>} : vector<8x32xf32>, vector<32x32xf32>, vector<8x32xf32> -> vector<8x32xf32>
    %c0_7 = arith.constant 0 : index
    %c0_8 = arith.constant 0 : index
    %6 = vector.load %arg4[%c0_7, %c0_8] : memref<32x32xf32, #tpu.memory_space<vmem>>, vector<32x32xf32>
    %cst_9 = arith.constant dense<0.000000e+00> : vector<8x32xf32>
    %7 = tpu.matmul %1, %6, %cst_9 {dimension_numbers = #tpu.dot_dimension_numbers<[1], [0], [0], [1], [0, 0, 1, 1], [], []>} : vector<8x32xf32>, vector<32x32xf32>, vector<8x32xf32> -> vector<8x32xf32>
    %cst_10 = arith.constant 0.353553385 : f32
    %8 = vector.broadcast %cst_10 : f32 to vector<8x32xf32>
    %9 = arith.mulf %3, %8 : vector<8x32xf32>
    %10 = vector.extract_strided_slice %9 {offsets = [0, 0], sizes = [8, 8], strides = [1, 1]} : vector<8x32xf32> to vector<8x8xf32>
    %11 = vector.extract_strided_slice %5 {offsets = [0, 0], sizes = [8, 8], strides = [1, 1]} : vector<8x32xf32> to vector<8x8xf32>
    %12 = vector.extract_strided_slice %7 {offsets = [0, 0], sizes = [8, 8], strides = [1, 1]} : vector<8x32xf32> to vector<8x8xf32>
    %cst_11 = arith.constant dense<0.000000e+00> : vector<8x8xf32>
    %13 = tpu.matmul %10, %11, %cst_11 {dimension_numbers = #tpu.dot_dimension_numbers<[1], [1], [0], [0], [0, 0, 1, 0], [], []>} : vector<8x8xf32>, vector<8x8xf32>, vector<8x8xf32> -> vector<8x8xf32>
    %cst_12 = arith.constant dense<0xFF800000> : vector<8xf32>
    %14 = vector.multi_reduction <maximumf>, %13, %cst_12 [1] : vector<8x8xf32> to vector<8xf32>
    %15 = vector.shape_cast %14 : vector<8xf32> to vector<8x1xf32>
    %16 = vector.broadcast %15 : vector<8x1xf32> to vector<8x8xf32>
    %17 = arith.subf %13, %16 : vector<8x8xf32>
    %18 = math.exp %17 : vector<8x8xf32>
    %cst_13 = arith.constant dense<0.000000e+00> : vector<8xf32>
    %19 = vector.multi_reduction <add>, %18, %cst_13 [1] : vector<8x8xf32> to vector<8xf32>
    %20 = vector.shape_cast %19 : vector<8xf32> to vector<8x1xf32>
    %cst_14 = arith.constant dense<0.000000e+00> : vector<8x8xf32>
    %21 = tpu.matmul %18, %12, %cst_14 {dimension_numbers = #tpu.dot_dimension_numbers<[1], [0], [0], [1], [0, 0, 1, 1], [], []>} : vector<8x8xf32>, vector<8x8xf32>, vector<8x8xf32> -> vector<8x8xf32>
    %22 = tpu.reciprocal %20 {approx = true} : vector<8x1xf32> -> vector<8x1xf32>
    %23 = vector.broadcast %22 : vector<8x1xf32> to vector<8x8xf32>
    %24 = arith.mulf %21, %23 : vector<8x8xf32>
    %c0_15 = arith.constant 0 : index
    %c0_16 = arith.constant 0 : index
    %c0_17 = arith.constant 0 : index
    %25 = vector.load %arg5[%c0_15, %c0_16, %c0_17] : memref<1x8x32xf32, #tpu.memory_space<vmem>>, vector<1x8x8xf32>
    %26 = vector.shape_cast %25 : vector<1x8x8xf32> to vector<8x8xf32>
    %27 = vector.shape_cast %24 : vector<8x8xf32> to vector<1x8x8xf32>
    tpu.vector_store %arg5[%c0_15, %c0_16, %c0_17], %27 {strides = array<i32>} : memref<1x8x32xf32, #tpu.memory_space<vmem>>, vector<1x8x8xf32>,
    %28 = vector.extract_strided_slice %9 {offsets = [0, 8], sizes = [8, 8], strides = [1, 1]} : vector<8x32xf32> to vector<8x8xf32>
    %29 = vector.extract_strided_slice %5 {offsets = [0, 8], sizes = [8, 8], strides = [1, 1]} : vector<8x32xf32> to vector<8x8xf32>
    %30 = vector.extract_strided_slice %7 {offsets = [0, 8], sizes = [8, 8], strides = [1, 1]} : vector<8x32xf32> to vector<8x8xf32>
    %cst_18 = arith.constant dense<0.000000e+00> : vector<8x8xf32>
    %31 = tpu.matmul %28, %29, %cst_18 {dimension_numbers = #tpu.dot_dimension_numbers<[1], [1], [0], [0], [0, 0, 1, 0], [], []>} : vector<8x8xf32>, vector<8x8xf32>, vector<8x8xf32> -> vector<8x8xf32>
    %cst_19 = arith.constant dense<0xFF800000> : vector<8xf32>
    %32 = vector.multi_reduction <maximumf>, %31, %cst_19 [1] : vector<8x8xf32> to vector<8xf32>
    %33 = vector.shape_cast %32 : vector<8xf32> to vector<8x1xf32>
    %34 = vector.broadcast %33 : vector<8x1xf32> to vector<8x8xf32>
    %35 = arith.subf %31, %34 : vector<8x8xf32>
    %36 = math.exp %35 : vector<8x8xf32>
    %cst_20 = arith.constant dense<0.000000e+00> : vector<8xf32>
    %37 = vector.multi_reduction <add>, %36, %cst_20 [1] : vector<8x8xf32> to vector<8xf32>
    %38 = vector.shape_cast %37 : vector<8xf32> to vector<8x1xf32>
    %cst_21 = arith.constant dense<0.000000e+00> : vector<8x8xf32>
    %39 = tpu.matmul %36, %30, %cst_21 {dimension_numbers = #tpu.dot_dimension_numbers<[1], [0], [0], [1], [0, 0, 1, 1], [], []>} : vector<8x8xf32>, vector<8x8xf32>, vector<8x8xf32> -> vector<8x8xf32>
    %40 = tpu.reciprocal %38 {approx = true} : vector<8x1xf32> -> vector<8x1xf32>
    %41 = vector.broadcast %40 : vector<8x1xf32> to vector<8x8xf32>
    %42 = arith.mulf %39, %41 : vector<8x8xf32>
    %c0_22 = arith.constant 0 : index
    %c0_23 = arith.constant 0 : index
    %c8 = arith.constant 8 : index
    %43 = vector.load %arg5[%c0_22, %c0_23, %c8] : memref<1x8x32xf32, #tpu.memory_space<vmem>>, vector<1x8x8xf32>
    %44 = vector.shape_cast %43 : vector<1x8x8xf32> to vector<8x8xf32>
    %45 = vector.shape_cast %42 : vector<8x8xf32> to vector<1x8x8xf32>
    tpu.vector_store %arg5[%c0_22, %c0_23, %c8], %45 {strides = array<i32>} : memref<1x8x32xf32, #tpu.memory_space<vmem>>, vector<1x8x8xf32>,
    %46 = vector.extract_strided_slice %9 {offsets = [0, 16], sizes = [8, 8], strides = [1, 1]} : vector<8x32xf32> to vector<8x8xf32>
    %47 = vector.extract_strided_slice %5 {offsets = [0, 16], sizes = [8, 8], strides = [1, 1]} : vector<8x32xf32> to vector<8x8xf32>
    %48 = vector.extract_strided_slice %7 {offsets = [0, 16], sizes = [8, 8], strides = [1, 1]} : vector<8x32xf32> to vector<8x8xf32>
    %cst_24 = arith.constant dense<0.000000e+00> : vector<8x8xf32>
    %49 = tpu.matmul %46, %47, %cst_24 {dimension_numbers = #tpu.dot_dimension_numbers<[1], [1], [0], [0], [0, 0, 1, 0], [], []>} : vector<8x8xf32>, vector<8x8xf32>, vector<8x8xf32> -> vector<8x8xf32>
    %cst_25 = arith.constant dense<0xFF800000> : vector<8xf32>
    %50 = vector.multi_reduction <maximumf>, %49, %cst_25 [1] : vector<8x8xf32> to vector<8xf32>
    %51 = vector.shape_cast %50 : vector<8xf32> to vector<8x1xf32>
    %52 = vector.broadcast %51 : vector<8x1xf32> to vector<8x8xf32>
    %53 = arith.subf %49, %52 : vector<8x8xf32>
    %54 = math.exp %53 : vector<8x8xf32>
    %cst_26 = arith.constant dense<0.000000e+00> : vector<8xf32>
    %55 = vector.multi_reduction <add>, %54, %cst_26 [1] : vector<8x8xf32> to vector<8xf32>
    %56 = vector.shape_cast %55 : vector<8xf32> to vector<8x1xf32>
    %cst_27 = arith.constant dense<0.000000e+00> : vector<8x8xf32>
    %57 = tpu.matmul %54, %48, %cst_27 {dimension_numbers = #tpu.dot_dimension_numbers<[1], [0], [0], [1], [0, 0, 1, 1], [], []>} : vector<8x8xf32>, vector<8x8xf32>, vector<8x8xf32> -> vector<8x8xf32>
    %58 = tpu.reciprocal %56 {approx = true} : vector<8x1xf32> -> vector<8x1xf32>
    %59 = vector.broadcast %58 : vector<8x1xf32> to vector<8x8xf32>
    %60 = arith.mulf %57, %59 : vector<8x8xf32>
    %c0_28 = arith.constant 0 : index
    %c0_29 = arith.constant 0 : index
    %c16 = arith.constant 16 : index
    %61 = vector.load %arg5[%c0_28, %c0_29, %c16] : memref<1x8x32xf32, #tpu.memory_space<vmem>>, vector<1x8x8xf32>
    %62 = vector.shape_cast %61 : vector<1x8x8xf32> to vector<8x8xf32>
    %63 = vector.shape_cast %60 : vector<8x8xf32> to vector<1x8x8xf32>
    tpu.vector_store %arg5[%c0_28, %c0_29, %c16], %63 {strides = array<i32>} : memref<1x8x32xf32, #tpu.memory_space<vmem>>, vector<1x8x8xf32>,
    %64 = vector.extract_strided_slice %9 {offsets = [0, 24], sizes = [8, 8], strides = [1, 1]} : vector<8x32xf32> to vector<8x8xf32>
    %65 = vector.extract_strided_slice %5 {offsets = [0, 24], sizes = [8, 8], strides = [1, 1]} : vector<8x32xf32> to vector<8x8xf32>
    %66 = vector.extract_strided_slice %7 {offsets = [0, 24], sizes = [8, 8], strides = [1, 1]} : vector<8x32xf32> to vector<8x8xf32>
    %cst_30 = arith.constant dense<0.000000e+00> : vector<8x8xf32>
    %67 = tpu.matmul %64, %65, %cst_30 {dimension_numbers = #tpu.dot_dimension_numbers<[1], [1], [0], [0], [0, 0, 1, 0], [], []>} : vector<8x8xf32>, vector<8x8xf32>, vector<8x8xf32> -> vector<8x8xf32>
    %cst_31 = arith.constant dense<0xFF800000> : vector<8xf32>
    %68 = vector.multi_reduction <maximumf>, %67, %cst_31 [1] : vector<8x8xf32> to vector<8xf32>
    %69 = vector.shape_cast %68 : vector<8xf32> to vector<8x1xf32>
    %70 = vector.broadcast %69 : vector<8x1xf32> to vector<8x8xf32>
    %71 = arith.subf %67, %70 : vector<8x8xf32>
    %72 = math.exp %71 : vector<8x8xf32>
    %cst_32 = arith.constant dense<0.000000e+00> : vector<8xf32>
    %73 = vector.multi_reduction <add>, %72, %cst_32 [1] : vector<8x8xf32> to vector<8xf32>
    %74 = vector.shape_cast %73 : vector<8xf32> to vector<8x1xf32>
    %cst_33 = arith.constant dense<0.000000e+00> : vector<8x8xf32>
    %75 = tpu.matmul %72, %66, %cst_33 {dimension_numbers = #tpu.dot_dimension_numbers<[1], [0], [0], [1], [0, 0, 1, 1], [], []>} : vector<8x8xf32>, vector<8x8xf32>, vector<8x8xf32> -> vector<8x8xf32>
    %76 = tpu.reciprocal %74 {approx = true} : vector<8x1xf32> -> vector<8x1xf32>
    %77 = vector.broadcast %76 : vector<8x1xf32> to vector<8x8xf32>
    %78 = arith.mulf %75, %77 : vector<8x8xf32>
    %c0_34 = arith.constant 0 : index
    %c0_35 = arith.constant 0 : index
    %c24 = arith.constant 24 : index
    %79 = vector.load %arg5[%c0_34, %c0_35, %c24] : memref<1x8x32xf32, #tpu.memory_space<vmem>>, vector<1x8x8xf32>
    %80 = vector.shape_cast %79 : vector<1x8x8xf32> to vector<8x8xf32>
    %81 = vector.shape_cast %78 : vector<8x8xf32> to vector<1x8x8xf32>
    tpu.vector_store %arg5[%c0_34, %c0_35, %c24], %81 {strides = array<i32>} : memref<1x8x32xf32, #tpu.memory_space<vmem>>, vector<1x8x8xf32>,
    return
  }
  func.func @transform_0(%arg0: i32) -> (i32, i32, i32) {
    %c0_i32 = arith.constant 0 : i32
    %c0_i32_0 = arith.constant 0 : i32
    %c0_i32_1 = arith.constant 0 : i32
    return %arg0, %c0_i32, %c0_i32_0 : i32, i32, i32
  }
  func.func @transform_1(%arg0: i32) -> (i32, i32) {
    %c0_i32 = arith.constant 0 : i32
    %c0_i32_0 = arith.constant 0 : i32
    %c0_i32_1 = arith.constant 0 : i32
    return %c0_i32, %c0_i32_0 : i32, i32
  }
  func.func @transform_2(%arg0: i32) -> (i32, i32) {
    %c0_i32 = arith.constant 0 : i32
    %c0_i32_0 = arith.constant 0 : i32
    %c0_i32_1 = arith.constant 0 : i32
    return %c0_i32, %c0_i32_0 : i32, i32
  }
  func.func @transform_3(%arg0: i32) -> (i32, i32) {
    %c0_i32 = arith.constant 0 : i32
    %c0_i32_0 = arith.constant 0 : i32
    %c0_i32_1 = arith.constant 0 : i32
    return %c0_i32, %c0_i32_0 : i32, i32
  }
  func.func @transform_4(%arg0: i32) -> (i32, i32, i32) {
    %c0_i32 = arith.constant 0 : i32
    %c0_i32_0 = arith.constant 0 : i32
    %c0_i32_1 = arith.constant 0 : i32
    return %arg0, %c0_i32, %c0_i32_0 : i32, i32, i32
  }
}

</mosaic_0001>

<bundles_post_ra>
// kernel: tpu_custom_call.1
= control target key start
LH: loop header
LB: loop body
LE: loop exit
PB: predicated region body
PF: predicated region fallthrough
CT: control target
= control target key end

     0   :  { %9 = vsyncpa [#allocation3], 0  ;;  %s2101_s0 = inlined_call_operand.hbm [shape: f32[2,8,32], index: 0, kind: input, shape index: {}]   ;;  %s2102_s1 = inlined_call_operand.hbm [shape: f32[32,32], index: 1, kind: input, shape index: {}]   ;;  %s2103_s2 = inlined_call_operand.hbm [shape: f32[32,32], index: 2, kind: input, shape index: {}]   ;;  %s2104_s3 = inlined_call_operand.hbm [shape: f32[32,32], index: 3, kind: input, shape index: {}]   ;;  %s2105_s4 = inlined_call_operand.hbm [shape: f32[2,8,32], index: 4, kind: output, shape index: {}]  }
   0x1   :  { %11 = vsyncpa [#allocation3 + $0x1], 0 }
   0x2   :  { %12 = vsyncpa [#allocation6], 0 }
   0x3   :  { %13 = vsyncpa [#allocation9], 0 }
   0x4   :  { %14 = vsyncpa [#allocation4], 0 }
   0x5   :  { %16 = vsyncpa [#allocation4 + $0x1], 0  ;;  %s1764_s15 = smov 0   ;;  %s1766_s16 = smov 0  }
   0x6   :  { %s1768_s17 = smov 0   ;;  %s1770_s18 = smov 0  }
   0x7 LB: > { %s1785_s19 = sadd.s32 4294967295, %s1721_s18   ;;  %s1274_s20 = sadd.s32 4294967294, %s1721_s18   ;;  %s1721_s18 = sphi %s1770_s18, %s2128_s18   ;;  %s1717_s17 = sphi %s1768_s17, %s2127_s17   ;;  %s1713_s16 = sphi %s1766_s16, %s2126_s16   ;;  %s1709_s15 = sphi %s1764_s15, %s2125_s15  }
   0x8   : > { %p42_p0 = scmp.ne.s32.totalorder %s1713_s16, %s1709_s15  ;;  %p2106_p1 = scmp.eq.s32.totalorder %s1785_s19, 0 }
   0x9   : > { %p135_p3 = scmp.eq.s32.totalorder %s1274_s20, 1  ;;  %p1275_p5 = scmp.ge.s32.totalorder %s1721_s18, 1 }
   0xa   : > { %p1794_p4 = por %p2106_p1, %p42_p0  ;;  %p142_p7 = scmp.lt.s32.totalorder %s1721_s18, 3 }
   0xb   : > { %p1799_p6 = por %p135_p3, %p42_p0  ;;  %s1723_s24 = smov [#allocation5]  }
   0xc   : > { %s2109_s21 = scalar_select %p1794_p4, 1, 0 }
   0xd   : > { %s2110_s22 = scalar_select %p1799_p6, 1, 0 }
   0xe   : > { %p1804_p8 = pnand %p1275_p5, %p142_p7  ;;  %s154_s25 = sshll.u32 %s1723_s24, 4  ;;  %s1808_s25 = int_to_ptr.vmem [resolvable:$true] %s154_s25 }
   0xf   : > { %s1724_s27 = smov [#allocation7]   ;;  %s1725_s29 = smov [#allocation8]  }
  0x10   : > { %s2111_s23 = scalar_select %p1804_p8, 1, 0 }
  0x11   : > { %p1445_p9 = pneg %p1804_p8  ;;  %s167_s28 = sshll.u32 %s1724_s27, 4  ;;  %s1819_s28 = int_to_ptr.vmem [resolvable:$true] %s167_s28 }
  0x12   : > { %s1821_s30 = sshll.u32 %s1725_s29, 4  ;;  %s1533_s7 = scalar_lea.hbm %s2102_s1, 512  ;;  %s181_s30 = int_to_ptr.vmem [resolvable:$true] %s1821_s30 }
  0x13   : > { %p1815_p11 = pnand %p1445_p9, %p2106_p1  ;;  %p1534_p12 = scmp.ne.s32.totalorder %s2102_s1, %s1533_s7 }
  0x14   : > { %p1540_p5 = scmp.lt.u32.totalorder %s1533_s7, %s2102_s1 }
  0x15   : > { %p1831_p13 = pneg %p1815_p11 }
  0x17   : > { %p1536_p0 = pnand %p1831_p13, %p1534_p12 }
  0x19   : > { %p1537_p3 = pneg %p1536_p0 }
  0x1b   : > { %p1542_p7 = pnand %p1540_p5, %p1537_p3 }
  0x1d   : > { %1545 = shalt.err (!%p1542_p7)
}
  0x1e   : > { %s1546_s13 = scalar_lea.vmem %s1808_s25, 512  ;;  %p1554_p2 = scmp.lt.s32.totalorder %s1808_s25, %s1808_s25 }
  0x1f   : > { %p1547_p9 = scmp.ne.s32.totalorder %s1808_s25, %s1546_s13  ;;  %p1555_p6 = scmp.lt.s32.totalorder %s1546_s13, %s1546_s13 }
  0x21   : > { %p1549_p10 = pnand %p1547_p9, %p1831_p13  ;;  %p1556_p12 = por %p1555_p6, %p1554_p2 }
  0x23   : > { %p1550_p1 = pneg %p1549_p10 }
  0x25   : > { %p1557_p0 = pnand %p1556_p12, %p1550_p1 }
  0x27   : > { %1560 = shalt.err (!%p1557_p0)
}
  0x28   : > { %s1726_s14 = smov 128   ;;  %s1727_s20 = smov 8  }
  0x29   : > { %1448 = dma.hbm_to_vmem [thread:$0]  (!%p1815_p11), %s2102_s1, 512, %s1808_s25, [#allocation6], %s1726_s14, %s1726_s14, %s1727_s20  }
  0x2a   : > { %s1561_s6 = scalar_lea.hbm %s2103_s2, 512 }
  0x2b   : > { %p1562_p1 = scmp.ne.s32.totalorder %s2103_s2, %s1561_s6  ;;  %p1568_p10 = scmp.lt.u32.totalorder %s1561_s6, %s2103_s2 }
  0x2d   : > { %p1564_p2 = pnand %p1562_p1, %p1831_p13 }
  0x2f   : > { %p1565_p6 = pneg %p1564_p2 }
  0x31   : > { %p1570_p3 = pnand %p1568_p10, %p1565_p6 }
  0x33   : > { %1573 = shalt.err (!%p1570_p3)
}
  0x34   : > { %s1574_s25 = scalar_lea.vmem %s1819_s28, 512  ;;  %p1582_p12 = scmp.lt.s32.totalorder %s1819_s28, %s1819_s28 }
  0x35   : > { %p1575_p5 = scmp.ne.s32.totalorder %s1819_s28, %s1574_s25  ;;  %p1583_p0 = scmp.lt.s32.totalorder %s1574_s25, %s1574_s25 }
  0x37   : > { %p1577_p7 = pnand %p1575_p5, %p1831_p13  ;;  %p1584_p1 = por %p1583_p0, %p1582_p12 }
  0x39   : > { %p1578_p9 = pneg %p1577_p7 }
  0x3b   : > { %p1585_p2 = pnand %p1584_p1, %p1578_p9 }
  0x3d   : > { %1588 = shalt.err (!%p1585_p2)
}
  0x3e   : > { %1451 = dma.hbm_to_vmem [thread:$0]  (!%p1815_p11), %s2103_s2, 512, %s1819_s28, [#allocation6], %s1726_s14, %s1726_s14, %s1727_s20  }
  0x3f   : > { %s1589_s29 = scalar_lea.hbm %s2104_s3, 512 }
  0x40   : > { %p1590_p6 = scmp.ne.s32.totalorder %s2104_s3, %s1589_s29  ;;  %p1596_p5 = scmp.lt.u32.totalorder %s1589_s29, %s2104_s3 }
  0x42   : > { %p1592_p10 = pnand %p1590_p6, %p1831_p13 }
  0x44   : > { %p1593_p3 = pneg %p1592_p10 }
  0x46   : > { %p1598_p7 = pnand %p1596_p5, %p1593_p3 }
  0x48   : > { %1601 = shalt.err (!%p1598_p7)
}
  0x49   : > { %s1602_s9 = scalar_lea.vmem %s181_s30, 512  ;;  %p1610_p1 = scmp.lt.s32.totalorder %s181_s30, %s181_s30 }
  0x4a   : > { %p1603_p9 = scmp.ne.s32.totalorder %s181_s30, %s1602_s9  ;;  %p1611_p2 = scmp.lt.s32.totalorder %s1602_s9, %s1602_s9 }
  0x4c   : > { %p1605_p12 = pnand %p1603_p9, %p1831_p13  ;;  %p1612_p4 = por %p1611_p2, %p1610_p1 }
  0x4e   : > { %p1606_p0 = pneg %p1605_p12 }
  0x50   : > { %p1613_p8 = pnand %p1612_p4, %p1606_p0 }
  0x52   : > { %1616 = shalt.err (!%p1613_p8)
}
  0x53   : > { %1454 = dma.hbm_to_vmem [thread:$0]  (!%p1815_p11), %s2104_s3, 512, %s181_s30, [#allocation9], %s1726_s14, %s1726_s14, %s1727_s20  }
  0x54   : > { %s1904_s10 = sadd.s32 1, %s1721_s18   ;;  %s29_s25 = sadd.s32 1, %s1717_s17 }
  0x55   : > { %s26_s26 = ssub.s32 %s1721_s18, %s1904_s10  ;;  %p36_p8 = scmp.ne.s32.totalorder %s1717_s17, %s1713_s16 }
  0x56   : > { %p27_p4 = scmp.eq.s32.totalorder %s26_s26, 0  ;;  %p37_p13 = scmp.eq.s32.totalorder %s1721_s18, 0 }
  0x57   : > { %p1466_p6 = scmp.lt.s32.totalorder %s1721_s18, 2  ;;  %p2114_p3 = scmp.eq.s32.totalorder %s1785_s19, 1 }
  0x58   : > { %s1914_s12 = scalar_select %p27_p4, %s1717_s17, %s29_s25  }
  0x59   : > { %p38_p10 = por %p37_p13, %p36_p8  ;;  %p1918_p5 = por %p2114_p3, %p36_p8 }
  0x5a   : > { %s194_s24 = sand.u32 1, %s1717_s17   ;;  %s1281_s27 = sshll.u32 %s1721_s18, 7 }
  0x5b   : > { %s1280_s30 = sshll.u32 %s194_s24, 3  ;;  %s1927_s29 = scalar_lea.hbm %s2101_s0, %s1281_s27 }
  0x5c   : > { %s198_s5 = scalar_lea.vmem [#allocation2], %s1280_s30  ;;  %p1929_p11 = pnand %p1466_p6, %p38_p10 }
  0x5d   : > { %s205_s6 = sshll.u32 %s198_s5, 4  ;;  %s195_s8 = scalar_lea.sflag [#allocation3], %s194_s24  ;;  %s1933_s6 = int_to_ptr.vmem [resolvable:$true] %s205_s6 }
  0x5e   : > { %s1617_s9 = scalar_lea.hbm %s1927_s29, 128  ;;  %p1619_p9 = pneg %p1929_p11 }
  0x5f   : > { %p1618_p7 = scmp.ne.s32.totalorder %s1927_s29, %s1617_s9  ;;  %s1622_s26 = scalar_lea.hbm %s2101_s0, 256 }
  0x60   : > { %p1623_p1 = scmp.lt.u32.totalorder %s1927_s29, %s2101_s0  ;;  %p1624_p2 = scmp.lt.u32.totalorder %s1622_s26, %s1617_s9 }
  0x61   : > { %p1620_p12 = pnand %p1619_p9, %p1618_p7  ;;  %p1626_p8 = scmp.lt.u32.totalorder %s1617_s9, %s1927_s29 }
  0x62   : > { %p1625_p4 = por %p1624_p2, %p1623_p1 }
  0x63   : > { %p1621_p0 = pneg %p1620_p12 }
  0x64   : > { %p1627_p13 = por %p1626_p8, %p1625_p4 }
  0x66   : > { %p1628_p6 = pnand %p1627_p13, %p1621_p0 }
  0x68   : > { %1631 = shalt.err (!%p1628_p6)
}
  0x69   : > { %s1632_s24 = scalar_lea.vmem %s1933_s6, 128  ;;  %s1728_s30 = smov [#allocation2]  }
  0x6a   : > { %p1633_p10 = scmp.ne.s32.totalorder %s1933_s6, %s1632_s24  ;;  %s1637_s14 = sshll.u32 %s1728_s30, 4  ;;  %s1638_s14 = int_to_ptr.vmem [resolvable:$false] %s1637_s14 }
  0x6b   : > { %s1639_s20 = scalar_lea.vmem %s1638_s14, 256  ;;  %p1640_p12 = scmp.lt.s32.totalorder %s1933_s6, %s1638_s14 }
  0x6c   : > { %p1635_p3 = pnand %p1633_p10, %p1619_p9  ;;  %p1641_p1 = scmp.lt.s32.totalorder %s1639_s20, %s1632_s24 }
  0x6e   : > { %p1636_p7 = pneg %p1635_p3  ;;  %p1642_p2 = por %p1641_p1, %p1640_p12 }
  0x70   : > { %p1643_p4 = pnand %p1642_p2, %p1636_p7 }
  0x72   : > { %1646 = shalt.err (!%p1643_p4)
}
  0x73   : > { %1458 = dma.hbm_to_vmem [thread:$0]  (!%p1929_p11), %s1927_s29, 128, %s1933_s6, %s195_s8  }
  0x74   : > { %p2117_p0 = scmp.ne.s32.totalorder %s2111_s23, 0 }
  0x75   : > { %s1963_s5 = sand.u32 (!%p2117_p0), 1, %s1713_s16   ;;  %p2118_p9 = scmp.ne.s32.totalorder (!%p2117_p0), %s2109_s21, 0 }
  0x76   : > { %214 = sbr.rel (%p2117_p0) target bundleno = 1197 (0x4ad), region = 36  ;;  %s1283_s9 = sshll.u32 (!%p2117_p0), %s1963_s5, 3 }
  0x77   : > { %s217_s28 = scalar_lea.sflag (!%p2117_p0), [#allocation3], %s1963_s5  ;;  %s1969_s11 = scalar_lea.vmem (!%p2117_p0), [#allocation2], %s1283_s9 }
  0x7d   : > { %1692 = dma.done.wait (%p2118_p9), %s217_s28, 128  }
  0x7e   : > { %1694 = vsyncadd (%p2118_p9), %s217_s28, 4294967168  ;;  %p2119_p11 = scmp.eq.s32.totalorder %s1785_s19, 0 }
  0x80   : > { %1696 = dma.done.wait (%p2119_p11), [#allocation6], 1024   ;;  %p2120_p8 = pmov %p2119_p11 }
  0x82   : > { %1698 = vsyncadd (%p2120_p8), [#allocation6], 4294966272  ;;  %p2121_p13 = pmov %p2120_p8 }
  0x83   : > { %p2122_p6 = pmov %p2120_p8 }
  0x84   : > { %1700 = dma.done.wait (%p2121_p13), [#allocation9], 512  }
  0x85   : > { %1702 = vsyncadd (%p2122_p6), [#allocation9], 4294966784  ;;  %v1729_v0 = vmov 0.0|0.0   ;;  %vm1730_vm0 = vmmov 0   ;;  %v1731_v1 = vmov 0.0   ;;  %v336_v2 = vld [vmem:[#allocation7] sm:$0xff] }
  0x86   : > { %1417 = vmatprep.subr.bf16.mxu1 %v1729_v0  ;;  %1411 = vmatprep.subr.bf16.mxu0 %v1729_v0  ;;  %v337_v3 = vld [vmem:[#allocation7 + $0x8] sm:$0xff]  ;;  %v258_v4 = vld [vmem:[#allocation5] sm:$0xff]  ;;  %v338_v7 = vld [vmem:[#allocation7 + $0x10] sm:$0xff]  ;;  %vm262_vm1 = vcmask 261120   ;;  %vm485_vm2 = vcmask 64512   ;;  %s1732_s21 = smov 112  }
  0x87   : > { %1357 = vmatprep.mubr.msk.f32.mxu1 %vm1730_vm0, %v1731_v1  ;;  %1346 = vmatprep.mubr.msk.f32.mxu0 %vm1730_vm0, %v1731_v1  ;;  %v1418_v5 = vpack.c.bf16 %v337_v3, %v336_v2  ;;  %v259_v6 = vld [vmem:[#allocation5 + $0x8] sm:$0xff]  ;;  %v339_v8 = vld [vmem:[#allocation7 + $0x18] sm:$0xff]  ;;  %v260_v10 = vld [vmem:[#allocation5 + $0x10] sm:$0xff]  ;;  %s1733_s23 = smov 120   ;;  %s1734_s29 = smov 104   ;;  %vm817_vm3 = vcmask 130112  }
  0x88   : > { %v1412_v9 = vpack.c.bf16 %v259_v6, %v258_v4  ;;  %v261_v11 = vld [vmem:[#allocation5 + $0x18] sm:$0xff]  ;;  %v1421_v12 = vpack.c.bf16 %v339_v8, %v338_v7  ;;  %v410_v15 = vld [vmem:[#allocation8] sm:$0xff]  ;;  %v411_v16 = vld [vmem:[#allocation8 + $0x8] sm:$0xff]  ;;  %s2045_s6 = scalar_lea.vmem [#allocation10], %s1283_s9  ;;  %s1735_s7 = smov 8   ;;  %vm988_vm4 = vcmask 195712  }
  0x89   : > { %1419 = vmatpush3.bf16.msra.mxu1 %v1418_v5  ;;  %v1415_v13 = vpack.c.bf16 %v261_v11, %v260_v10  ;;  %v257_v14 = vld [vmem:[%s1969_s11] sm:$0xff]  ;;  %v1424_v18 = vpack.c.bf16 %v411_v16, %v410_v15  ;;  %s1736_s8 = smov 16   ;;  %s1737_s26 = smov 24   ;;  %vm1159_vm5 = vcmask 261312  }
  0x8a   : > { %1413 = vmatpush3.bf16.msra.mxu0 %v1412_v9  ;;  %1420 = vmatprep.subr.bf16.mxu1 %v1729_v0  ;;  %v412_v17 = vld [vmem:[#allocation8 + $0x10] sm:$0xff]  ;;  %v413_v19 = vld [vmem:[#allocation8 + $0x18] sm:$0xff]  ;;  %s1304_s25 = sshll.u32 %s1785_s19, 7  ;;  %s1175_s27 = sshll.u32 %s2045_s6, 4  ;;  %s2058_s27 = int_to_ptr.vmem [resolvable:$true] %s1175_s27 }
  0x8b   : > { %1414 = vmatprep.subr.bf16.mxu0 %v1729_v0  ;;  %v1427_v20 = vpack.c.bf16 %v413_v19, %v412_v17  ;;  %s2056_s14 = scalar_lea.hbm %s2105_s4, %s1304_s25  ;;  %s1162_s20 = scalar_lea.sflag [#allocation4], %s1963_s5 }
  0x8c   : > { %s1647_s9 = scalar_lea.vmem %s2058_s27, 128  ;;  %s1738_s19 = smov [#allocation10]  }
  0x8d   : > { %1422 = vmatpush3.bf16.msra.mxu1 %v1421_v12  ;;  %p1648_p10 = scmp.ne.s32.totalorder %s2058_s27, %s1647_s9  ;;  %s1651_s28 = sshll.u32 %s1738_s19, 4  ;;  %s1652_s28 = int_to_ptr.vmem [resolvable:$false] %s1651_s28 }
  0x8e   : > { %1416 = vmatpush3.bf16.msra.mxu0 %v1415_v13  ;;  %1371 = vmatprep.subr.mxu1 %v1731_v1  ;;  %s1653_s11 = scalar_lea.vmem %s1652_s28, 256  ;;  %p1654_p12 = scmp.lt.s32.totalorder %s2058_s27, %s1652_s28 }
  0x8f   : > { %1423 = vmatprep.subr.bf16.mxu0 %v1729_v0  ;;  %p1649_p3 = pnand %p1648_p10, %p1918_p5  ;;  %p1655_p1 = scmp.lt.s32.totalorder %s1653_s11, %s1647_s9 }
  0x90   : > { %1358 = vmatmul.mubr.msk.f32.vlgmr.msra.gmra.mrb[0].mxu1 %vm262_vm1, %v257_v14 }
  0x91   : > { %1347 = vmatmul.mubr.msk.f32.vlgmr.msra.gmra.mrb[0].mxu0 %vm262_vm1, %v257_v14  ;;  %1373 = vmatprep.mubr.msk.f32.mxu1 %vm1730_vm0, %v1731_v1  ;;  %p1650_p7 = pneg %p1649_p3  ;;  %p1656_p2 = por %p1655_p1, %p1654_p12 }
  0x92   : > { %1368 = vmatprep.mubr.msk.f32.mxu0 %vm1730_vm0, %v1731_v1  ;;  %1425 = vmatpush3.bf16.msra.mxu0 %v1424_v18 }
  0x93   : > { %1426 = vmatprep.subr.bf16.mxu0 %v1729_v0  ;;  %p1657_p4 = pnand %p1656_p2, %p1650_p7 }
  0x96   : > { %1428 = vmatpush3.bf16.msra.mxu0 %v1427_v20 }
  0x97   : > { %1381 = vmatprep.subr.mxu0 %v1731_v1 }
  0x99   : > { %1369 = vmatmul.mubr.msk.f32.vlgmr.msra.gmra.mrb[2].mxu0 %vm262_vm1, %v257_v14 }
  0x9a   : > { %1383 = vmatprep.mubr.msk.f32.mxu0 %vm1730_vm0, %v1731_v1 }
 0x163   : > { %v406_v21 = vpop.f32.mrb[0].mxu1 }
 0x164   : > { %821 = vrot.lane.b32.xlu1 %v406_v21, %s1732_s21  ;;  %649 = vrot.lane.b32.xlu0 %v406_v21, %s1733_s23  ;;  %v332_v22 = vpop.f32.mrb[0].mxu0  ;;  %v1359_v23 = vpop.f32.mrb[1].mxu1 }
 0x165   : > { %v484_v24 = vmul.f32 0.35355338, %v332_v22  ;;  %1372 = vmatpush3.xpose.msk.msra.mxu1 %vm485_vm2, %v406_v21  ;;  %v1348_v25 = vpop.f32.mrb[1].mxu0 }
 0x166   : > { %1376 = vmatprep.subr.mxu1 %v1731_v1 }
 0x168   : > { %1374 = vmatmul.mubr.msk.f32.vlgmr.msra.gmra.mrb[2].mxu1 %vm485_vm2, %v484_v24  ;;  %819 = vrot.lane.b32.xlu1 %v484_v24, %s1732_s21 }
 0x169   : > { %647 = vrot.lane.b32.xlu0 %v484_v24, %s1733_s23  ;;  %1378 = vmatprep.mubr.msk.f32.mxu1 %vm1730_vm0, %v1731_v1 }
 0x16c   : > { %990 = vrot.lane.b32.xlu1 %v484_v24, %s1734_s29  ;;  %v480_v26 = vpop.f32.mrb[2].mxu0 }
 0x16d   : > { %992 = vrot.lane.b32.xlu0 %v406_v21, %s1734_s29  ;;  %v1370_v27 = vpop.f32.mrb[3].mxu0  ;;  %1377 = vmatpush3.msra.mxu1 %v480_v26 }
 0x16e   : > { %1386 = vmatprep.subr.mxu1 %v1731_v1 }
 0x170   : > { %735 = vrot.lane.b32.xlu1 %v480_v26, %s1733_s23 }
 0x1d6   : > { %v650_v28 = vpop.permute.xlu0 %649  ;;  %v822_v29 = vpop.permute.xlu1 %821 }
 0x1d7   : > { %1382 = vmatpush3.xpose.msk.msra.mxu0 %vm485_vm2, %v650_v28 }
 0x1d8   : > { %1391 = vmatprep.subr.mxu0 %v1731_v1 }
 0x1da   : > { %v820_v31 = vpop.permute.xlu1 %819 }
 0x1db   : > { %v648_v30 = vpop.permute.xlu0 %647 }
 0x1dc   : > { %1384 = vmatmul.mubr.msk.f32.vlgmr.msra.gmra.mrb[4].mxu0 %vm485_vm2, %v648_v30 }
 0x1dd   : > { %1392 = vmatpush3.xpose.msk.msra.mxu0 %vm485_vm2, %v822_v29  ;;  %1393 = vmatprep.mubr.msk.f32.mxu0 %vm1730_vm0, %v1731_v1 }
 0x1de   : > { %1401 = vmatprep.subr.mxu0 %v1731_v1  ;;  %v991_v33 = vpop.permute.xlu1 %990 }
 0x1df   : > { %v993_v32 = vpop.permute.xlu0 %992 }
 0x1e0   : > { %1394 = vmatmul.mubr.msk.f32.vlgmr.msra.gmra.mrb[6].mxu0 %vm485_vm2, %v820_v31 }
 0x1e1   : > { %1402 = vmatpush3.xpose.msk.msra.mxu0 %vm485_vm2, %v993_v32  ;;  %1403 = vmatprep.mubr.msk.f32.mxu0 %vm1730_vm0, %v1731_v1 }
 0x1e2   : > { %v736_v49 = vpop.permute.xlu1 %735 }
 0x1e4   : > { %1404 = vmatmul.mubr.msk.f32.vlgmr.msra.gmra.mrb[8].mxu0 %vm485_vm2, %v991_v33 }
 0x23b   : > { %v558_v34 = vpop.f32.mrb[2].mxu1 }
 0x23c   : > { %v1375_v35 = vpop.f32.mrb[3].mxu1  ;;  %v562_v36 = vsel %vm485_vm2, %v558_v34, -inf }
 0x23d   : > { %563 = vmax.xlane.f32.xlu0 %v562_v36 }
 0x2af   : > { %v721_v37 = vpop.f32.mrb[4].mxu0 }
 0x2b0   : > { %v1385_v38 = vpop.f32.mrb[5].mxu0  ;;  %v725_v39 = vsel %vm485_vm2, %v721_v37, -inf }
 0x2b1   : > { %726 = vmax.xlane.f32.xlu1 %v725_v39 }
 0x2b3   : > { %v893_v40 = vpop.f32.mrb[6].mxu0 }
 0x2b4   : > { %v1395_v41 = vpop.f32.mrb[7].mxu0  ;;  %v897_v42 = vsel %vm485_vm2, %v893_v40, -inf }
 0x2b5   : > { %898 = vmax.xlane.f32.xlu0 %v897_v42 }
 0x2b7   : > { %v1064_v43 = vpop.f32.mrb[8].mxu0 }
 0x2b8   : > { %v1405_v44 = vpop.f32.mrb[9].mxu0  ;;  %v1068_v45 = vsel %vm485_vm2, %v1064_v43, -inf }
 0x2b9   : > { %1069 = vmax.xlane.f32.xlu0 %v1068_v45 }
 0x2c2   : > { %1077 = vrot.lane.b32.xlu1 %v480_v26, %s1734_s29 }
 0x2ca   : > { %v564_v46 = vpop.xlane.xlu0 %563 }
 0x2cb   : > { %v565_v47 = vsub.f32 %v558_v34, %v564_v46 }
 0x2cd   : > { %v566_v48 = vmul.f32 1.442695, %v565_v47 }
 0x2cf   : > { %1517 = vpow2.f32 %v566_v48  ;;  %906 = vrot.lane.b32.xlu0 %v480_v26, %s1732_s21 }
 0x2d9   : > { %v1518_v50 = vpop.eup %1517 }
 0x2da   : > { %1379 = vmatmul.mubr.msk.f32.vlgmr.msra.gmra.mrb[4].mxu1 %vm485_vm2, %v1518_v50  ;;  %v568_v2 = vsel %vm485_vm2, %v1518_v50, 0.0 }
 0x2db   : > { %1387 = vmatpush3.msra.mxu1 %v736_v49  ;;  %1388 = vmatprep.mubr.msk.f32.mxu1 %vm1730_vm0, %v1731_v1 }
 0x2dc   : > { %1396 = vmatprep.subr.mxu1 %v1731_v1 }
 0x33e   : > { %v727_v51 = vpop.xlane.xlu1 %726 }
 0x33f   : > { %v728_v52 = vsub.f32 %v721_v37, %v727_v51 }
 0x341   : > { %v729_v53 = vmul.f32 1.442695, %v728_v52 }
 0x342   : > { %v899_v54 = vpop.xlane.xlu0 %898  ;;  %v1078_v0 = vpop.permute.xlu1 %1077 }
 0x343   : > { %1519 = vpow2.f32 %v729_v53  ;;  %v900_v55 = vsub.f32 %v893_v40, %v899_v54 }
 0x345   : > { %v901_v56 = vmul.f32 1.442695, %v900_v55 }
 0x346   : > { %v1070_v57 = vpop.xlane.xlu0 %1069 }
 0x347   : > { %1521 = vpow2.f32 %v901_v56  ;;  %v1071_v58 = vsub.f32 %v1064_v43, %v1070_v57 }
 0x349   : > { %v1072_v59 = vmul.f32 1.442695, %v1071_v58 }
 0x34a   : > { %v907_v61 = vpop.permute.xlu0 %906 }
 0x34b   : > { %1523 = vpow2.f32 %v1072_v59 }
 0x34d   : > { %v1520_v60 = vpop.eup %1519 }
 0x34e   : > { %1389 = vmatmul.mubr.msk.f32.vlgmr.msra.gmra.mrb[6].mxu1 %vm485_vm2, %v1520_v60  ;;  %v731_v62 = vsel %vm485_vm2, %v1520_v60, 0.0 }
 0x34f   : > { %1397 = vmatpush3.msra.mxu1 %v907_v61  ;;  %732 = vadd.xlane.f32.xlu1 %v731_v62 }
 0x350   : > { %1398 = vmatprep.mubr.msk.f32.mxu1 %vm1730_vm0, %v1731_v1  ;;  %1406 = vmatprep.subr.mxu1 %v1731_v1 }
 0x351   : > { %v1522_v63 = vpop.eup %1521 }
 0x352   : > { %1399 = vmatmul.mubr.msk.f32.vlgmr.msra.gmra.mrb[8].mxu1 %vm485_vm2, %v1522_v63  ;;  %v903_v3 = vsel %vm485_vm2, %v1522_v63, 0.0 }
 0x353   : > { %1407 = vmatpush3.msra.mxu1 %v1078_v0  ;;  %569 = vadd.xlane.f32.xlu1 %v568_v2 }
 0x354   : > { %904 = vadd.xlane.f32.xlu0 %v903_v3  ;;  %1408 = vmatprep.mubr.msk.f32.mxu1 %vm1730_vm0, %v1731_v1 }
 0x355   : > { %v1524_v4 = vpop.eup %1523 }
 0x356   : > { %1409 = vmatmul.mubr.msk.f32.vlgmr.msra.gmra.mrb[10].mxu1 %vm485_vm2, %v1524_v4  ;;  %v1074_v5 = vsel %vm485_vm2, %v1524_v4, 0.0 }
 0x358   : > { %1075 = vadd.xlane.f32.xlu0 %v1074_v5 }
 0x3ad   : > { %v640_v6 = vpop.f32.mrb[4].mxu1 }
 0x3ae   : > { %v1380_v7 = vpop.f32.mrb[5].mxu1 }
 0x3dc   : > { %v733_v8 = vpop.xlane.xlu1 %732 }
 0x3e0   : > { %v570_v9 = vpop.xlane.xlu1 %569 }
 0x3e1   : > { %1525 = vrcp.f32 %v570_v9  ;;  %v905_v1 = vpop.xlane.xlu0 %904 }
 0x3e2   : > { %1527 = vrcp.f32 %v733_v8 }
 0x3e3   : > { %1529 = vrcp.f32 %v905_v1 }
 0x3e5   : > { %v1076_v12 = vpop.xlane.xlu0 %1075 }
 0x3e6   : > { %1531 = vrcp.f32 %v1076_v12 }
 0x3eb   : > { %v1526_v10 = vpop.eup %1525 }
 0x3ec   : > { %v645_v11 = vmul.f32 %v1526_v10, %v640_v6  ;;  %v1528_v13 = vpop.eup %1527 }
 0x3ed   : > { %v1530_v17 = vpop.eup %1529 }
 0x3ee   : > { %646 = vst.msk [vmem:[%s2045_s6] sm:$0xff] %vm485_vm2, %v645_v11 }
 0x3f0   : > { %v1532_v21 = vpop.eup %1531 }
 0x421   : > { %v807_v14 = vpop.f32.mrb[6].mxu1 }
 0x422   : > { %v812_v15 = vmul.f32 %v1528_v13, %v807_v14  ;;  %v1390_v16 = vpop.f32.mrb[7].mxu1 }
 0x424   : > { %814 = vrot.lane.b32.xlu0 %v812_v15, %s1735_s7 }
 0x425   : > { %v978_v18 = vpop.f32.mrb[8].mxu1 }
 0x426   : > { %v983_v19 = vmul.f32 %v1530_v17, %v978_v18  ;;  %v1400_v20 = vpop.f32.mrb[9].mxu1 }
 0x428   : > { %985 = vrot.lane.b32.xlu1 %v983_v19, %s1736_s8 }
 0x429   : > { %v1149_v22 = vpop.f32.mrb[10].mxu1 }
 0x42a   : > { %v1154_v23 = vmul.f32 %v1532_v21, %v1149_v22  ;;  %v1410_v24 = vpop.f32.mrb[11].mxu1 }
 0x42c   : > { %1156 = vrot.lane.b32.xlu1 %v1154_v23, %s1737_s26 }
 0x496   : > { %v815_v25 = vpop.permute.xlu0 %814 }
 0x497   : > { %818 = vst.msk [vmem:[%s2045_s6] sm:$0xff] %vm817_vm3, %v815_v25 }
 0x49a   : > { %v986_v26 = vpop.permute.xlu1 %985 }
 0x49b   : > { %989 = vst.msk [vmem:[%s2045_s6] sm:$0xff] %vm988_vm4, %v986_v26 }
 0x49e   : > { %v1157_v27 = vpop.permute.xlu1 %1156 }
 0x49f   : > { %1160 = vst.msk [vmem:[%s2045_s6] sm:$0xff] %vm1159_vm5, %v1157_v27 }
 0x4a0   : > { %1660 = shalt.err (!%p1657_p4)
}
 0x4a1   : > { %s1661_s5 = scalar_lea.hbm %s2056_s14, 128  ;;  %s1665_s29 = scalar_lea.hbm %s2105_s4, 256 }
 0x4a2   : > { %p1662_p0 = scmp.ne.s32.totalorder %s2056_s14, %s1661_s5  ;;  %p1666_p8 = scmp.lt.u32.totalorder %s2056_s14, %s2105_s4 }
 0x4a3   : > { %p1667_p13 = scmp.lt.u32.totalorder %s1665_s29, %s1661_s5  ;;  %p1669_p10 = scmp.lt.u32.totalorder %s1661_s5, %s2056_s14 }
 0x4a4   : > { %p1663_p9 = pnand %p1662_p0, %p1918_p5 }
 0x4a5   : > { %p1668_p6 = por %p1667_p13, %p1666_p8 }
 0x4a6   : > { %p1664_p11 = pneg %p1663_p9 }
 0x4a7   : > { %p1670_p3 = por %p1669_p10, %p1668_p6 }
 0x4a9   : > { %p1671_p7 = pnand %p1670_p3, %p1664_p11 }
 0x4ab   : > { %1674 = shalt.err (!%p1671_p7)
}
 0x4ac   : > { %1443 = dma.vmem_to_hbm [thread:$0]  (%p1918_p5), %s2058_s27, 128, %s2056_s14, %s1162_s20  }
 0x4ad PF: > { %s1187_s8 = sand.u32 1, %s1709_s15   ;;  %p2123_p12 = scmp.ne.s32.totalorder %s2110_s22, 0 }
 0x4ae   : > { %p2124_p1 = scmp.ge.s32.totalorder %s1721_s18, 2  ;;  %s1188_s26 = scalar_lea.sflag [#allocation4], %s1187_s8 }
 0x4b0   : > { %p1460_p2 = pnand %p2124_p1, %p2123_p12 }
 0x4b2   : > { %1704 = dma.done.wait (!%p1460_p2), %s1188_s26, 128  }
 0x4b3   : > { %1706 = vsyncadd (!%p1460_p2), %s1188_s26, 4294967168  ;;  %p19_p4 = scmp.ge.s32.totalorder %s1904_s10, 4   ;;  %s2125_s15 = smov %s1713_s16 }
 0x4b4   : > { %s2126_s16 = smov %s1717_s17  ;;  %s2127_s17 = smov %s1914_s12 }
 0x4b5   : > { %s2128_s18 = smov %s1904_s10  ;;  %21 = sbr.rel (!%p19_p4) target bundleno = 7 (0x7), region = 93 }
 0x4bc   :  { %1193 = vsyncpa [#allocation3], 1 }
 0x4bd   :  { %1195 = vsyncpa [#allocation3 + $0x1], 1 }
 0x4be   :  { %1196 = vsyncpa [#allocation6], 1 }
 0x4bf   :  { %1197 = vsyncpa [#allocation9], 1 }
 0x4c0   :  { %1198 = vsyncpa [#allocation4], 1 }
 0x4c1   :  { %1200 = vsyncpa [#allocation4 + $0x1], 1 }

</bundles_post_ra>
